<compile_context>
chip_gen: v7x
topology: tpu7x:2x2x1
jax: 0.10.0
libtpu: 0.0.40
codegen_flags: <defaults>
</compile_context>

<pallas_src>
import numpy as np
import jax
import jax.numpy as jnp
from jax import lax
from jax.experimental import pallas as pl
from jax.experimental.pallas import tpu as pltpu

# ----------------------------- configuration --------------------------------
B = 2          # batch
DIMS = 32      # channels (ResBlock `dims`)
L = 128        # time steps (lane-dense last dim)
EPS = 1e-5


# ------------------------------- kernel --------------------------------------
def _bn_train_2d(h, gamma, beta):
    """BatchNorm1d, training-mode batch statistics, single-pass reduction.

    h: (C, N) f32 with N = batch*time folded into lanes; gamma/beta: (C, 1).

    Perf: h and h*h are stacked along sublanes so both sums come out of ONE
    cross-lane reduction (one XLU pass) instead of two *dependent* passes —
    the lane reductions sit squarely on the kernel's MXU->XLU->EUP critical
    path while the MXU is idle.

    Numerics: var = E[h^2] - E[h]^2 (biased, like torch).  Cancellation is a
    non-issue here (post-conv activations are ~zero-mean); clamp >= 0 anyway.
    """
    c, n = h.shape
    stacked = jnp.concatenate([h, h * h], axis=0)              # (2C, N), sublane stack
    sums = jnp.sum(stacked, axis=1, keepdims=True)             # (2C, 1)  one pass
    mean = sums[:c] * (1.0 / n)
    var = jnp.maximum(sums[c:] * (1.0 / n) - mean * mean, 0.0)
    return (h - mean) * (lax.rsqrt(var + EPS) * gamma) + beta


def resblock_stack_kernel(x_ref, w1_ref, g1_ref, b1_ref, w2_ref, g2_ref, b2_ref, o_ref):
    batch, chans, length = x_ref.shape            # static at trace time
    num_blocks = w1_ref.shape[0]

    # Fold batch into the lane axis: (B, C, L) -> (C, B*L). Lane-aligned
    # (L is a multiple of 128) so this is vreg placement, not a VMEM copy.
    x = jnp.concatenate([x_ref[b] for b in range(batch)], axis=1)   # (C, B*L) f32

    # All ResBlocks fused in one pallas_call: activation never leaves VMEM.
    for n in range(num_blocks):                                 # static unroll
        residual = x                                            # f32

        # conv1 (1x1, no bias) -> BN1 (batch stats) -> ReLU
        w1 = w1_ref[n].astype(jnp.bfloat16)
        h = jnp.dot(w1, x.astype(jnp.bfloat16),
                    preferred_element_type=jnp.float32)
        h = jnp.maximum(_bn_train_2d(h, g1_ref[n], b1_ref[n]), 0.0)

        # conv2 (1x1, no bias) -> BN2 (batch stats)
        w2 = w2_ref[n].astype(jnp.bfloat16)
        y = jnp.dot(w2, h.astype(jnp.bfloat16),
                    preferred_element_type=jnp.float32)
        y = _bn_train_2d(y, g2_ref[n], b2_ref[n])

        x = y + residual                                        # residual add, f32

    for b in range(batch):                                      # lane-aligned slices
        o_ref[b] = x[:, b * length:(b + 1) * length]


# ------------------------------ pallas wrapper --------------------------------
def resblock_forward(x_ncl, params):
    """x_ncl: (B, DIMS, L) float32, same NCL layout as the PyTorch module input.

    params hold a stack of `num_blocks` ResBlocks (leading axis); num_blocks=1
    is exactly the spec module's forward.
    """
    ins = (x_ncl, params['w1'], params['g1'], params['b1'],
           params['w2'], params['g2'], params['b2'])
    return pl.pallas_call(
        resblock_stack_kernel,
        out_shape=jax.ShapeDtypeStruct(x_ncl.shape, jnp.float32),
        in_specs=[pl.BlockSpec(memory_space=pltpu.MemorySpace.VMEM)] * len(ins),
        out_specs=pl.BlockSpec(memory_space=pltpu.MemorySpace.VMEM),
    )(*ins)


# ------------------------------- parameters ----------------------------------
def make_params(key, num_blocks=1):
    ks = jax.random.split(key, 6)
    return dict(
        w1=0.2 * jax.random.normal(ks[0], (num_blocks, DIMS, DIMS), jnp.float32),
        w2=0.2 * jax.random.normal(ks[1], (num_blocks, DIMS, DIMS), jnp.float32),
        g1=1.0 + 0.1 * jax.random.normal(ks[2], (num_blocks, DIMS, 1), jnp.float32),
        b1=0.1 * jax.random.normal(ks[3], (num_blocks, DIMS, 1), jnp.float32),
        g2=1.0 + 0.1 * jax.random.normal(ks[4], (num_blocks, DIMS, 1), jnp.float32),
        b2=0.1 * jax.random.normal(ks[5], (num_blocks, DIMS, 1), jnp.float32),
    )


# -------------------------- pure-JAX reference check --------------------------
def _bn_ref(x, gamma, beta):
    mean = jnp.mean(x, axis=(0, 2), keepdims=True)
    var = jnp.mean((x - mean) ** 2, axis=(0, 2), keepdims=True)
    return (x - mean) * lax.rsqrt(var + EPS) * gamma + beta


def reference_forward(x, p):
    for i in range(p['w1'].shape[0]):
        res = x
        h = jnp.einsum('oc,bcl->bol', p['w1'][i], x)
        h = jax.nn.relu(_bn_ref(h, p['g1'][i], p['b1'][i]))
        y = jnp.einsum('oc,bcl->bol', p['w2'][i], h)
        x = _bn_ref(y, p['g2'][i], p['b2'][i]) + res
    return x


# ----------------------------------- main -------------------------------------
if __name__ == "__main__":
    key = jax.random.PRNGKey(0)
    k_p1, k_p3, k_input = jax.random.split(key, 3)
    x = jax.random.normal(k_input, (B, DIMS, L), jnp.float32)   # NCL, like torch

    # --- single ResBlock: exactly the spec module's forward ---
    params1 = make_params(k_p1, num_blocks=1)
    out = resblock_forward(x, params1)
    jax.block_until_ready(out)
    assert out.shape == (B, DIMS, L)
    ref = reference_forward(x, params1)
    np.testing.assert_allclose(np.asarray(out), np.asarray(ref), rtol=2e-2, atol=2e-2)

    # --- fused 3-block stack (perf feedback: one pallas_call for the stack) ---
    params3 = make_params(k_p3, num_blocks=3)
    out3 = resblock_forward(x, params3)
    jax.block_until_ready(out3)
    ref3 = reference_forward(x, params3)
    np.testing.assert_allclose(np.asarray(out3), np.asarray(ref3), rtol=5e-2, atol=5e-2)

    # TODO(synk): BatchNorm running_mean/running_var buffer updates (a stateful
    # side effect of the torch forward in training mode) are not emitted.

    print("KERNEL_OK")
</pallas_src>

<mosaic_0001>
module attributes {stable_mosaic.version = 11 : i64} {
  func.func @resblock_stack_kernel(%arg0: memref<2x32x128xf32, #tpu.memory_space<vmem>>, %arg1: memref<1x32x32xf32, #tpu.memory_space<vmem>>, %arg2: memref<1x32x1xf32, #tpu.memory_space<vmem>>, %arg3: memref<1x32x1xf32, #tpu.memory_space<vmem>>, %arg4: memref<1x32x32xf32, #tpu.memory_space<vmem>>, %arg5: memref<1x32x1xf32, #tpu.memory_space<vmem>>, %arg6: memref<1x32x1xf32, #tpu.memory_space<vmem>>, %arg7: memref<2x32x128xf32, #tpu.memory_space<vmem>>) attributes {dimension_semantics = [], scalar_prefetch = 0 : i64, scratch_operands = 0 : i64, tpu.core_type = #tpu.core_type<tc>} {
    %c0 = arith.constant 0 : index
    %c0_0 = arith.constant 0 : index
    %c0_1 = arith.constant 0 : index
    %0 = vector.load %arg0[%c0, %c0_0, %c0_1] : memref<2x32x128xf32, #tpu.memory_space<vmem>>, vector<1x32x128xf32>
    %1 = vector.shape_cast %0 : vector<1x32x128xf32> to vector<32x128xf32>
    %c1 = arith.constant 1 : index
    %c0_2 = arith.constant 0 : index
    %c0_3 = arith.constant 0 : index
    %2 = vector.load %arg0[%c1, %c0_2, %c0_3] : memref<2x32x128xf32, #tpu.memory_space<vmem>>, vector<1x32x128xf32>
    %3 = vector.shape_cast %2 : vector<1x32x128xf32> to vector<32x128xf32>
    %4 = tpu.concatenate %1, %3 in 1 : vector<32x128xf32>, vector<32x128xf32> -> vector<32x256xf32>
    %c0_4 = arith.constant 0 : index
    %c0_5 = arith.constant 0 : index
    %c0_6 = arith.constant 0 : index
    %5 = vector.load %arg1[%c0_4, %c0_5, %c0_6] : memref<1x32x32xf32, #tpu.memory_space<vmem>>, vector<1x32x32xf32>
    %6 = vector.shape_cast %5 : vector<1x32x32xf32> to vector<32x32xf32>
    %7 = arith.truncf %6 : vector<32x32xf32> to vector<32x32xbf16>
    %8 = arith.truncf %4 : vector<32x256xf32> to vector<32x256xbf16>
    %cst = arith.constant dense<0.000000e+00> : vector<32x256xf32>
    %9 = tpu.matmul %7, %8, %cst {dimension_numbers = #tpu.dot_dimension_numbers<[1], [0], [0], [1], [0, 0, 1, 1], [], []>} : vector<32x32xbf16>, vector<32x256xbf16>, vector<32x256xf32> -> vector<32x256xf32>
    %c0_7 = arith.constant 0 : index
    %c0_8 = arith.constant 0 : index
    %c0_9 = arith.constant 0 : index
    %10 = vector.load %arg2[%c0_7, %c0_8, %c0_9] : memref<1x32x1xf32, #tpu.memory_space<vmem>>, vector<1x32x1xf32>
    %11 = vector.shape_cast %10 : vector<1x32x1xf32> to vector<32x1xf32>
    %c0_10 = arith.constant 0 : index
    %c0_11 = arith.constant 0 : index
    %c0_12 = arith.constant 0 : index
    %12 = vector.load %arg3[%c0_10, %c0_11, %c0_12] : memref<1x32x1xf32, #tpu.memory_space<vmem>>, vector<1x32x1xf32>
    %13 = vector.shape_cast %12 : vector<1x32x1xf32> to vector<32x1xf32>
    %14 = arith.mulf %9, %9 : vector<32x256xf32>
    %15 = tpu.concatenate %9, %14 in 0 : vector<32x256xf32>, vector<32x256xf32> -> vector<64x256xf32>
    %cst_13 = arith.constant dense<0.000000e+00> : vector<64xf32>
    %16 = vector.multi_reduction <add>, %15, %cst_13 [1] : vector<64x256xf32> to vector<64xf32>
    %17 = vector.shape_cast %16 : vector<64xf32> to vector<64x1xf32>
    %18 = vector.extract_strided_slice %17 {offsets = [0, 0], sizes = [32, 1], strides = [1, 1]} : vector<64x1xf32> to vector<32x1xf32>
    %cst_14 = arith.constant 3.906250e-03 : f32
    %19 = vector.broadcast %cst_14 : f32 to vector<32x1xf32>
    %20 = arith.mulf %18, %19 : vector<32x1xf32>
    %21 = vector.extract_strided_slice %17 {offsets = [32, 0], sizes = [32, 1], strides = [1, 1]} : vector<64x1xf32> to vector<32x1xf32>
    %cst_15 = arith.constant 3.906250e-03 : f32
    %22 = vector.broadcast %cst_15 : f32 to vector<32x1xf32>
    %23 = arith.mulf %21, %22 : vector<32x1xf32>
    %24 = arith.mulf %20, %20 : vector<32x1xf32>
    %25 = arith.subf %23, %24 : vector<32x1xf32>
    %cst_16 = arith.constant 0.000000e+00 : f32
    %26 = vector.broadcast %cst_16 : f32 to vector<32x1xf32>
    %27 = arith.maximumf %25, %26 : vector<32x1xf32>
    %28 = vector.broadcast %20 : vector<32x1xf32> to vector<32x256xf32>
    %29 = arith.subf %9, %28 : vector<32x256xf32>
    %cst_17 = arith.constant 9.99999974E-6 : f32
    %30 = vector.broadcast %cst_17 : f32 to vector<32x1xf32>
    %31 = arith.addf %27, %30 : vector<32x1xf32>
    %32 = math.rsqrt %31 : vector<32x1xf32>
    %33 = arith.mulf %32, %11 : vector<32x1xf32>
    %34 = vector.broadcast %33 : vector<32x1xf32> to vector<32x256xf32>
    %35 = arith.mulf %29, %34 : vector<32x256xf32>
    %36 = vector.broadcast %13 : vector<32x1xf32> to vector<32x256xf32>
    %37 = arith.addf %35, %36 : vector<32x256xf32>
    %cst_18 = arith.constant 0.000000e+00 : f32
    %38 = vector.broadcast %cst_18 : f32 to vector<32x256xf32>
    %39 = arith.maximumf %37, %38 : vector<32x256xf32>
    %c0_19 = arith.constant 0 : index
    %c0_20 = arith.constant 0 : index
    %c0_21 = arith.constant 0 : index
    %40 = vector.load %arg4[%c0_19, %c0_20, %c0_21] : memref<1x32x32xf32, #tpu.memory_space<vmem>>, vector<1x32x32xf32>
    %41 = vector.shape_cast %40 : vector<1x32x32xf32> to vector<32x32xf32>
    %42 = arith.truncf %41 : vector<32x32xf32> to vector<32x32xbf16>
    %43 = arith.truncf %39 : vector<32x256xf32> to vector<32x256xbf16>
    %cst_22 = arith.constant dense<0.000000e+00> : vector<32x256xf32>
    %44 = tpu.matmul %42, %43, %cst_22 {dimension_numbers = #tpu.dot_dimension_numbers<[1], [0], [0], [1], [0, 0, 1, 1], [], []>} : vector<32x32xbf16>, vector<32x256xbf16>, vector<32x256xf32> -> vector<32x256xf32>
    %c0_23 = arith.constant 0 : index
    %c0_24 = arith.constant 0 : index
    %c0_25 = arith.constant 0 : index
    %45 = vector.load %arg5[%c0_23, %c0_24, %c0_25] : memref<1x32x1xf32, #tpu.memory_space<vmem>>, vector<1x32x1xf32>
    %46 = vector.shape_cast %45 : vector<1x32x1xf32> to vector<32x1xf32>
    %c0_26 = arith.constant 0 : index
    %c0_27 = arith.constant 0 : index
    %c0_28 = arith.constant 0 : index
    %47 = vector.load %arg6[%c0_26, %c0_27, %c0_28] : memref<1x32x1xf32, #tpu.memory_space<vmem>>, vector<1x32x1xf32>
    %48 = vector.shape_cast %47 : vector<1x32x1xf32> to vector<32x1xf32>
    %49 = arith.mulf %44, %44 : vector<32x256xf32>
    %50 = tpu.concatenate %44, %49 in 0 : vector<32x256xf32>, vector<32x256xf32> -> vector<64x256xf32>
    %cst_29 = arith.constant dense<0.000000e+00> : vector<64xf32>
    %51 = vector.multi_reduction <add>, %50, %cst_29 [1] : vector<64x256xf32> to vector<64xf32>
    %52 = vector.shape_cast %51 : vector<64xf32> to vector<64x1xf32>
    %53 = vector.extract_strided_slice %52 {offsets = [0, 0], sizes = [32, 1], strides = [1, 1]} : vector<64x1xf32> to vector<32x1xf32>
    %cst_30 = arith.constant 3.906250e-03 : f32
    %54 = vector.broadcast %cst_30 : f32 to vector<32x1xf32>
    %55 = arith.mulf %53, %54 : vector<32x1xf32>
    %56 = vector.extract_strided_slice %52 {offsets = [32, 0], sizes = [32, 1], strides = [1, 1]} : vector<64x1xf32> to vector<32x1xf32>
    %cst_31 = arith.constant 3.906250e-03 : f32
    %57 = vector.broadcast %cst_31 : f32 to vector<32x1xf32>
    %58 = arith.mulf %56, %57 : vector<32x1xf32>
    %59 = arith.mulf %55, %55 : vector<32x1xf32>
    %60 = arith.subf %58, %59 : vector<32x1xf32>
    %cst_32 = arith.constant 0.000000e+00 : f32
    %61 = vector.broadcast %cst_32 : f32 to vector<32x1xf32>
    %62 = arith.maximumf %60, %61 : vector<32x1xf32>
    %63 = vector.broadcast %55 : vector<32x1xf32> to vector<32x256xf32>
    %64 = arith.subf %44, %63 : vector<32x256xf32>
    %cst_33 = arith.constant 9.99999974E-6 : f32
    %65 = vector.broadcast %cst_33 : f32 to vector<32x1xf32>
    %66 = arith.addf %62, %65 : vector<32x1xf32>
    %67 = math.rsqrt %66 : vector<32x1xf32>
    %68 = arith.mulf %67, %46 : vector<32x1xf32>
    %69 = vector.broadcast %68 : vector<32x1xf32> to vector<32x256xf32>
    %70 = arith.mulf %64, %69 : vector<32x256xf32>
    %71 = vector.broadcast %48 : vector<32x1xf32> to vector<32x256xf32>
    %72 = arith.addf %70, %71 : vector<32x256xf32>
    %73 = arith.addf %72, %4 : vector<32x256xf32>
    %74 = vector.extract_strided_slice %73 {offsets = [0, 0], sizes = [32, 128], strides = [1, 1]} : vector<32x256xf32> to vector<32x128xf32>
    %c0_34 = arith.constant 0 : index
    %c0_35 = arith.constant 0 : index
    %c0_36 = arith.constant 0 : index
    %75 = vector.load %arg7[%c0_34, %c0_35, %c0_36] : memref<2x32x128xf32, #tpu.memory_space<vmem>>, vector<1x32x128xf32>
    %76 = vector.shape_cast %75 : vector<1x32x128xf32> to vector<32x128xf32>
    %77 = vector.shape_cast %74 : vector<32x128xf32> to vector<1x32x128xf32>
    tpu.vector_store %arg7[%c0_34, %c0_35, %c0_36], %77 {strides = array<i32>} : memref<2x32x128xf32, #tpu.memory_space<vmem>>, vector<1x32x128xf32>,
    %78 = vector.extract_strided_slice %73 {offsets = [0, 128], sizes = [32, 128], strides = [1, 1]} : vector<32x256xf32> to vector<32x128xf32>
    %c1_37 = arith.constant 1 : index
    %c0_38 = arith.constant 0 : index
    %c0_39 = arith.constant 0 : index
    %79 = vector.load %arg7[%c1_37, %c0_38, %c0_39] : memref<2x32x128xf32, #tpu.memory_space<vmem>>, vector<1x32x128xf32>
    %80 = vector.shape_cast %79 : vector<1x32x128xf32> to vector<32x128xf32>
    %81 = vector.shape_cast %78 : vector<32x128xf32> to vector<1x32x128xf32>
    tpu.vector_store %arg7[%c1_37, %c0_38, %c0_39], %81 {strides = array<i32>} : memref<2x32x128xf32, #tpu.memory_space<vmem>>, vector<1x32x128xf32>,
    return
  }
}

</mosaic_0001>

<bundles_post_ra>
// kernel: tpu_custom_call.1
= control target key start
LH: loop header
LB: loop body
LE: loop exit
PB: predicated region body
PF: predicated region fallthrough
CT: control target
= control target key end

     0   :  { %v543_v7 = vmov 0   ;;  %s887_s0 = inlined_call_operand.vmem [shape: f32[2,32,128], index: 0, kind: input, shape index: {}]   ;;  %s888_s1 = inlined_call_operand.vmem [shape: f32[1,32,32], index: 1, kind: input, shape index: {}]   ;;  %s889_s2 = inlined_call_operand.vmem [shape: f32[1,32,1], index: 2, kind: input, shape index: {}]   ;;  %s890_s3 = inlined_call_operand.vmem [shape: f32[1,32,1], index: 3, kind: input, shape index: {}]   ;;  %s891_s4 = inlined_call_operand.vmem [shape: f32[1,32,32], index: 4, kind: input, shape index: {}]   ;;  %s892_s5 = inlined_call_operand.vmem [shape: f32[1,32,1], index: 5, kind: input, shape index: {}]   ;;  %s893_s6 = inlined_call_operand.vmem [shape: f32[1,32,1], index: 6, kind: input, shape index: {}]   ;;  %s894_s7 = inlined_call_operand.hbm [shape: f32[2,32,128], index: 7, kind: output, shape index: {}]  }
   0x1   :  { %v590_v0 = vld [vmem:[%s887_s0 + $0x20] sm:$0xff]  ;;  %v595_v1 = vld [vmem:[%s887_s0 + $0x28] sm:$0xff]  ;;  %v612_v5 = vld [vmem:[%s887_s0 + $0x30] sm:$0xff]  ;;  %86 = vmatprep.mubr.bf16.mxu0 %v543_v7  ;;  %502 = vset.pattern.permute.xlu1 %v543_v7 }
   0x2   :  { %v600_v2 = vld [vmem:[%s887_s0] sm:$0xff]  ;;  %v44_v3 = vpack.c.bf16 %v595_v1, %v590_v0  ;;  %v607_v4 = vld [vmem:[%s887_s0 + $0x8] sm:$0xff]  ;;  %v617_v6 = vld [vmem:[%s887_s0 + $0x38] sm:$0xff]  ;;  %501 = vset.pattern.permute.xlu0 %v543_v7  ;;  %299 = vmatprep.mubr.bf16.mxu1 %v543_v7 }
   0x3   :  { %v43_v8 = vpack.c.bf16 %v607_v4, %v600_v2  ;;  %v46_v9 = vpack.c.bf16 %v617_v6, %v612_v5  ;;  %v628_v10 = vld [vmem:[%s887_s0 + $0x10] sm:$0xff]  ;;  %v633_v11 = vld [vmem:[%s887_s0 + $0x18] sm:$0xff]  ;;  %v37_v13 = vld [vmem:[%s888_s1] sm:$0xff] }
   0x4   :  { %54 = vmatprep.subr.bf16.mxu0 %v44_v3  ;;  %v45_v12 = vpack.c.bf16 %v633_v11, %v628_v10  ;;  %v38_v14 = vld [vmem:[%s888_s1 + $0x8] sm:$0xff] }
   0x5   :  { %55 = vmatpush1.bf16.msra.mxu0 %v43_v8 }
   0x6   :  { %12 = vsyncpa [#allocation3], 0  ;;  %56 = vmatprep.subr.bf16.mxu0 %v46_v9  ;;  %v41_v15 = vpack.c.bf16 %v38_v14, %v37_v13  ;;  %vm47_vm0 = vcmask 261120   ;;  %v39_v16 = vld [vmem:[%s888_s1 + $0x10] sm:$0xff]  ;;  %v40_v17 = vld [vmem:[%s888_s1 + $0x18] sm:$0xff] }
   0x7   :  { %v42_v18 = vpack.c.bf16 %v40_v17, %v39_v16  ;;  %v111_v43 = vld [vmem:[%s890_s3] sm:$0xff]  ;;  %v112_v44 = vld [vmem:[%s890_s3 + $0x8] sm:$0xff]  ;;  %v113_v45 = vld [vmem:[%s890_s3 + $0x10] sm:$0xff] }
   0x9   :  { %57 = vmatpush1.bf16.msra.mxu0 %v45_v12 }
   0xc   :  { %493 = vmatmul.mubr.msk.bf16.vlgmr.msra.gmra.mrb[0].mxu0 %vm47_vm0, %v41_v15 }
   0xd   :  { %96 = vmatprep.mubr.bf16.mxu0 %v543_v7 }
  0x14   :  { %494 = vmatmul.mubr.msk.bf16.gmra.mrb[4].mxu0 %vm47_vm0, %v42_v18 }
  0xdf   :  { %v654_v19 = vpop.f32.mrb[0].mxu0 }
  0xe0   :  { %v656_v20 = vpop.f32.mrb[1].mxu0  ;;  %v115_v21 = vmul.f32 %v654_v19, %v654_v19 }
  0xe1   :  { %v660_v22 = vpop.f32.mrb[2].mxu0  ;;  %v123_v23 = vadd.f32 %v656_v20, %v654_v19  ;;  %v116_v24 = vmul.f32 %v656_v20, %v656_v20 }
  0xe2   :  { %v666_v25 = vpop.f32.mrb[3].mxu0  ;;  %v117_v26 = vmul.f32 %v660_v22, %v660_v22 }
  0xe3   :  { %124 = vadd.xlane.f32.xlu0 %v123_v23  ;;  %v135_v27 = vadd.f32 %v116_v24, %v115_v21  ;;  %v126_v28 = vadd.f32 %v666_v25, %v660_v22  ;;  %v118_v29 = vmul.f32 %v666_v25, %v666_v25 }
  0xe5   :  { %136 = vadd.xlane.f32.xlu1 %v135_v27  ;;  %v138_v30 = vadd.f32 %v118_v29, %v117_v26 }
  0xe7   :  { %127 = vadd.xlane.f32.xlu0 %v126_v28  ;;  %v674_v31 = vpop.f32.mrb[4].mxu0 }
  0xe8   :  { %v676_v32 = vpop.f32.mrb[5].mxu0  ;;  %v119_v33 = vmul.f32 %v674_v31, %v674_v31 }
  0xe9   :  { %139 = vadd.xlane.f32.xlu1 %v138_v30  ;;  %v680_v34 = vpop.f32.mrb[6].mxu0  ;;  %v129_v35 = vadd.f32 %v676_v32, %v674_v31  ;;  %v120_v36 = vmul.f32 %v676_v32, %v676_v32  ;;  %v107_v30 = vld [vmem:[%s889_s2] sm:$0xff] }
  0xea   :  { %v686_v37 = vpop.f32.mrb[7].mxu0  ;;  %v121_v38 = vmul.f32 %v680_v34, %v680_v34 }
  0xeb   :  { %v122_v39 = vmul.f32 %v686_v37, %v686_v37  ;;  %130 = vadd.xlane.f32.xlu0 %v129_v35  ;;  %v132_v40 = vadd.f32 %v686_v37, %v680_v34  ;;  %v141_v41 = vadd.f32 %v120_v36, %v119_v33 }
  0xed   :  { %133 = vadd.xlane.f32.xlu1 %v132_v40  ;;  %v144_v42 = vadd.f32 %v122_v39, %v121_v38 }
  0xef   :  { %142 = vadd.xlane.f32.xlu0 %v141_v41  ;;  %v110_v41 = vld [vmem:[%s889_s2 + $0x18] sm:$0xff] }
  0xf1   :  { %145 = vadd.xlane.f32.xlu1 %v144_v42 }
 0x102   :  { %217 = vperm.xlu1 %502, %v111_v43   ;;  %v114_v43 = vld [vmem:[%s890_s3 + $0x18] sm:$0xff] }
 0x106   :  { %222 = vperm.xlu1 %502, %v112_v44  }
 0x10a   :  { %227 = vperm.xlu1 %502, %v113_v45  }
 0x170   :  { %v125_v46 = vpop.xlane.xlu0 %124 }
 0x171   :  { %v703_v47 = vmul.f32 0.00390625, %v125_v46 }
 0x172   :  { %v137_v48 = vpop.xlane.xlu1 %136 }
 0x173   :  { %v155_v49 = vmul.f32 %v703_v47, %v703_v47  ;;  %v151_v50 = vmul.f32 0.00390625, %v137_v48  ;;  %v167_v51 = vsub.f32 %v654_v19, %v703_v47  ;;  %v168_v52 = vsub.f32 %v656_v20, %v703_v47 }
 0x174   :  { %v128_v53 = vpop.xlane.xlu0 %127 }
 0x175   :  { %v159_v54 = vsub.f32 %v151_v50, %v155_v49  ;;  %v711_v55 = vmul.f32 0.00390625, %v128_v53 }
 0x176   :  { %v140_v56 = vpop.xlane.xlu1 %139 }
 0x177   :  { %v163_v57 = vmax.f32 %v159_v54, 0.0  ;;  %v156_v58 = vmul.f32 %v711_v55, %v711_v55  ;;  %v152_v59 = vmul.f32 0.00390625, %v140_v56  ;;  %v169_v60 = vsub.f32 %v660_v22, %v711_v55 }
 0x178   :  { %v131_v61 = vpop.xlane.xlu0 %130  ;;  %v170_v62 = vsub.f32 %v666_v25, %v711_v55 }
 0x179   :  { %v175_v63 = vadd.f32 1e-05, %v163_v57  ;;  %v160_v3 = vsub.f32 %v152_v59, %v156_v58  ;;  %v719_v8 = vmul.f32 0.00390625, %v131_v61 }
 0x17a   :  { %v134_v9 = vpop.xlane.xlu1 %133 }
 0x17b   :  { %503 = vrsqrt.f32 %v175_v63  ;;  %v164_v12 = vmax.f32 %v160_v3, 0.0  ;;  %v721_v13 = vmul.f32 0.00390625, %v134_v9  ;;  %v171_v15 = vsub.f32 %v674_v31, %v719_v8 }
 0x17c   :  { %v143_v14 = vpop.xlane.xlu0 %142  ;;  %v172_v16 = vsub.f32 %v676_v32, %v719_v8  ;;  %v157_v18 = vmul.f32 %v719_v8, %v719_v8 }
 0x17d   :  { %v176_v17 = vadd.f32 1e-05, %v164_v12  ;;  %v153_v19 = vmul.f32 0.00390625, %v143_v14  ;;  %v173_v20 = vsub.f32 %v680_v34, %v721_v13  ;;  %v174_v22 = vsub.f32 %v686_v37, %v721_v13  ;;  %v108_v34 = vld [vmem:[%s889_s2 + $0x8] sm:$0xff]  ;;  %v109_v37 = vld [vmem:[%s889_s2 + $0x10] sm:$0xff] }
 0x17e   :  { %v146_v21 = vpop.xlane.xlu1 %145  ;;  %v158_v24 = vmul.f32 %v721_v13, %v721_v13 }
 0x17f   :  { %505 = vrsqrt.f32 %v176_v17  ;;  %v161_v23 = vsub.f32 %v153_v19, %v157_v18  ;;  %v154_v25 = vmul.f32 0.00390625, %v146_v21 }
 0x181   :  { %v165_v26 = vmax.f32 %v161_v23, 0.0  ;;  %v162_v27 = vsub.f32 %v154_v25, %v158_v24 }
 0x182   :  { %v218_v44 = vpop.permute.xlu1 %217 }
 0x183   :  { %v177_v28 = vadd.f32 1e-05, %v165_v26  ;;  %v166_v29 = vmax.f32 %v162_v27, 0.0  ;;  %v251_v27 = vld [vmem:[%s891_s4] sm:$0xff] }
 0x185   :  { %v504_v31 = vpop.eup %503  ;;  %507 = vrsqrt.f32 %v177_v28  ;;  %v178_v32 = vadd.f32 1e-05, %v166_v29  ;;  %v254_v29 = vld [vmem:[%s891_s4 + $0x18] sm:$0xff] }
 0x186   :  { %v183_v33 = vmul.f32 %v504_v31, %v107_v30  ;;  %v223_v45 = vpop.permute.xlu1 %222 }
 0x187   :  { %509 = vrsqrt.f32 %v178_v32 }
 0x188   :  { %189 = vperm.xlu0 %501, %v183_v33  }
 0x189   :  { %v506_v35 = vpop.eup %505 }
 0x18a   :  { %v184_v36 = vmul.f32 %v506_v35, %v108_v34  ;;  %v228_v46 = vpop.permute.xlu1 %227 }
 0x18c   :  { %194 = vperm.xlu1 %502, %v184_v36  }
 0x18f   :  { %v508_v38 = vpop.eup %507 }
 0x190   :  { %v185_v39 = vmul.f32 %v508_v38, %v109_v37 }
 0x191   :  { %v510_v40 = vpop.eup %509 }
 0x192   :  { %199 = vperm.xlu1 %502, %v185_v39   ;;  %v186_v42 = vmul.f32 %v510_v40, %v110_v41 }
 0x196   :  { %204 = vperm.xlu1 %502, %v186_v42  }
 0x19a   :  { %232 = vperm.xlu1 %502, %v114_v43  }
 0x207   :  { %v190_v47 = vpop.permute.xlu0 %189 }
 0x208   :  { %v207_v48 = vmul.f32 %v190_v47, %v167_v51  ;;  %v208_v49 = vmul.f32 %v190_v47, %v168_v52 }
 0x20a   :  { %v235_v53 = vadd.f32 %v218_v44, %v207_v48  ;;  %v236_v56 = vadd.f32 %v218_v44, %v208_v49 }
 0x20b   :  { %v195_v50 = vpop.permute.xlu1 %194 }
 0x20c   :  { %v209_v54 = vmul.f32 %v195_v50, %v169_v60  ;;  %v210_v55 = vmul.f32 %v195_v50, %v170_v62  ;;  %v244_v59 = vmax.f32 %v236_v56, 0.0  ;;  %v243_v63 = vmax.f32 %v235_v53, 0.0  ;;  %v324_v56 = vld [vmem:[%s893_s6] sm:$0xff] }
 0x20e   :  { %v237_v57 = vadd.f32 %v223_v45, %v209_v54  ;;  %v238_v58 = vadd.f32 %v223_v45, %v210_v55 }
 0x210   :  { %v246_v61 = vmax.f32 %v238_v58, 0.0  ;;  %v245_v3 = vmax.f32 %v237_v57, 0.0  ;;  %v325_v57 = vld [vmem:[%s893_s6 + $0x8] sm:$0xff] }
 0x211   :  { %v200_v8 = vpop.permute.xlu1 %199 }
 0x212   :  { %v258_v9 = vpack.c.bf16 %v246_v61, %v244_v59  ;;  %v257_v12 = vpack.c.bf16 %v245_v3, %v243_v63  ;;  %v211_v13 = vmul.f32 %v200_v8, %v171_v15  ;;  %v212_v14 = vmul.f32 %v200_v8, %v172_v16  ;;  %v252_v15 = vld [vmem:[%s891_s4 + $0x8] sm:$0xff] }
 0x214   :  { %267 = vmatprep.subr.bf16.mxu1 %v258_v9  ;;  %v239_v52 = vadd.f32 %v228_v46, %v211_v13  ;;  %v240_v17 = vadd.f32 %v228_v46, %v212_v14 }
 0x215   :  { %268 = vmatpush1.bf16.msra.mxu1 %v257_v12  ;;  %v205_v51 = vpop.permute.xlu1 %204 }
 0x216   :  { %v213_v18 = vmul.f32 %v205_v51, %v173_v20  ;;  %v214_v60 = vmul.f32 %v205_v51, %v174_v22  ;;  %v247_v23 = vmax.f32 %v239_v52, 0.0  ;;  %v248_v24 = vmax.f32 %v240_v17, 0.0  ;;  %v253_v22 = vld [vmem:[%s891_s4 + $0x10] sm:$0xff] }
 0x217   :  { %v255_v20 = vpack.c.bf16 %v252_v15, %v251_v27  ;;  %v256_v30 = vpack.c.bf16 %v254_v29, %v253_v22 }
 0x219   :  { %v233_v62 = vpop.permute.xlu1 %232 }
 0x21a   :  { %v241_v19 = vadd.f32 %v233_v62, %v213_v18  ;;  %v242_v21 = vadd.f32 %v233_v62, %v214_v60 }
 0x21c   :  { %v249_v25 = vmax.f32 %v241_v19, 0.0  ;;  %v250_v26 = vmax.f32 %v242_v21, 0.0 }
 0x21e   :  { %v260_v16 = vpack.c.bf16 %v250_v26, %v248_v24  ;;  %v259_v28 = vpack.c.bf16 %v249_v25, %v247_v23 }
 0x220   :  { %269 = vmatprep.subr.bf16.mxu1 %v260_v16 }
 0x221   :  { %270 = vmatpush1.bf16.msra.mxu1 %v259_v28 }
 0x224   :  { %495 = vmatmul.mubr.msk.bf16.vlgmr.msra.gmra.mrb[0].mxu1 %vm47_vm0, %v255_v20 }
 0x225   :  { %309 = vmatprep.mubr.bf16.mxu1 %v543_v7 }
 0x22c   :  { %496 = vmatmul.mubr.msk.bf16.gmra.mrb[4].mxu1 %vm47_vm0, %v256_v30 }
 0x2f7   :  { %v765_v31 = vpop.f32.mrb[0].mxu1 }
 0x2f8   :  { %v767_v32 = vpop.f32.mrb[1].mxu1  ;;  %v328_v33 = vmul.f32 %v765_v31, %v765_v31 }
 0x2f9   :  { %v771_v34 = vpop.f32.mrb[2].mxu1  ;;  %v336_v7 = vadd.f32 %v767_v32, %v765_v31  ;;  %v329_v35 = vmul.f32 %v767_v32, %v767_v32 }
 0x2fa   :  { %v777_v36 = vpop.f32.mrb[3].mxu1  ;;  %v330_v37 = vmul.f32 %v771_v34, %v771_v34 }
 0x2fb   :  { %337 = vadd.xlane.f32.xlu1 %v336_v7  ;;  %v339_v38 = vadd.f32 %v777_v36, %v771_v34  ;;  %v331_v39 = vmul.f32 %v777_v36, %v777_v36  ;;  %v348_v40 = vadd.f32 %v329_v35, %v328_v33 }
 0x2fd   :  { %340 = vadd.xlane.f32.xlu0 %v339_v38  ;;  %v351_v41 = vadd.f32 %v331_v39, %v330_v37 }
 0x2ff   :  { %352 = vadd.xlane.f32.xlu1 %v351_v41  ;;  %v785_v42 = vpop.f32.mrb[4].mxu1 }
 0x300   :  { %v787_v43 = vpop.f32.mrb[5].mxu1  ;;  %v332_v44 = vmul.f32 %v785_v42, %v785_v42 }
 0x301   :  { %349 = vadd.xlane.f32.xlu0 %v348_v40  ;;  %v791_v45 = vpop.f32.mrb[6].mxu1  ;;  %v342_v46 = vadd.f32 %v787_v43, %v785_v42  ;;  %v333_v47 = vmul.f32 %v787_v43, %v787_v43 }
 0x302   :  { %v797_v48 = vpop.f32.mrb[7].mxu1  ;;  %v334_v49 = vmul.f32 %v791_v45, %v791_v45 }
 0x303   :  { %v335_v50 = vmul.f32 %v797_v48, %v797_v48  ;;  %v345_v53 = vadd.f32 %v797_v48, %v791_v45  ;;  %v354_v54 = vadd.f32 %v333_v47, %v332_v44  ;;  %v321_v44 = vld [vmem:[%s892_s5 + $0x8] sm:$0xff] }
 0x305   :  { %343 = vadd.xlane.f32.xlu0 %v342_v46  ;;  %346 = vadd.xlane.f32.xlu1 %v345_v53  ;;  %v357_v55 = vadd.f32 %v335_v50, %v334_v49  ;;  %v323_v49 = vld [vmem:[%s892_s5 + $0x18] sm:$0xff] }
 0x309   :  { %355 = vadd.xlane.f32.xlu0 %v354_v54  ;;  %358 = vadd.xlane.f32.xlu1 %v357_v55 }
 0x31a   :  { %430 = vperm.xlu1 %502, %v324_v56   ;;  %v326_v56 = vld [vmem:[%s893_s6 + $0x10] sm:$0xff] }
 0x31f   :  { %435 = vperm.xlu0 %501, %v325_v57   ;;  %v327_v57 = vld [vmem:[%s893_s6 + $0x18] sm:$0xff] }
 0x388   :  { %v338_v58 = vpop.xlane.xlu1 %337 }
 0x389   :  { %v811_v59 = vmul.f32 0.00390625, %v338_v58 }
 0x38a   :  { %v341_v61 = vpop.xlane.xlu0 %340 }
 0x38b   :  { %v813_v63 = vmul.f32 0.00390625, %v341_v61  ;;  %v380_v3 = vsub.f32 %v765_v31, %v811_v59  ;;  %v381_v8 = vsub.f32 %v767_v32, %v811_v59  ;;  %v368_v18 = vmul.f32 %v811_v59, %v811_v59 }
 0x38c   :  { %v353_v9 = vpop.xlane.xlu1 %352 }
 0x38d   :  { %v369_v12 = vmul.f32 %v813_v63, %v813_v63  ;;  %v365_v13 = vmul.f32 0.00390625, %v353_v9  ;;  %v382_v14 = vsub.f32 %v771_v34, %v813_v63  ;;  %v383_v51 = vsub.f32 %v777_v36, %v813_v63 }
 0x38e   :  { %v350_v52 = vpop.xlane.xlu0 %349 }
 0x38f   :  { %v373_v17 = vsub.f32 %v365_v13, %v369_v12  ;;  %v364_v60 = vmul.f32 0.00390625, %v350_v52 }
 0x391   :  { %v377_v62 = vmax.f32 %v373_v17, 0.0  ;;  %v372_v19 = vsub.f32 %v364_v60, %v368_v18 }
 0x392   :  { %v344_v21 = vpop.xlane.xlu0 %343  ;;  %v347_v23 = vpop.xlane.xlu1 %346 }
 0x393   :  { %v389_v24 = vadd.f32 1e-05, %v377_v62  ;;  %v376_v25 = vmax.f32 %v372_v19, 0.0  ;;  %v827_v26 = vmul.f32 0.00390625, %v344_v21  ;;  %v829_v27 = vmul.f32 0.00390625, %v347_v23 }
 0x395   :  { %511 = vrsqrt.f32 %v389_v24  ;;  %v388_v15 = vadd.f32 1e-05, %v376_v25  ;;  %v370_v16 = vmul.f32 %v827_v26, %v827_v26  ;;  %v386_v22 = vsub.f32 %v791_v45, %v829_v27 }
 0x396   :  { %v356_v28 = vpop.xlane.xlu0 %355  ;;  %v359_v20 = vpop.xlane.xlu1 %358  ;;  %v387_v29 = vsub.f32 %v797_v48, %v829_v27  ;;  %v384_v30 = vsub.f32 %v785_v42, %v827_v26  ;;  %v385_v33 = vsub.f32 %v787_v43, %v827_v26  ;;  %v371_v7 = vmul.f32 %v829_v27, %v829_v27  ;;  %v320_v43 = vld [vmem:[%s892_s5] sm:$0xff]  ;;  %v322_v48 = vld [vmem:[%s892_s5 + $0x10] sm:$0xff]  ;;  %s544_s5 = smov [#allocation2]  }
 0x397   :  { %513 = vrsqrt.f32 %v388_v15  ;;  %v366_v34 = vmul.f32 0.00390625, %v356_v28  ;;  %v367_v35 = vmul.f32 0.00390625, %v359_v20  ;;  %s478_s6 = sshll.u32 %s544_s5, 4  ;;  %s479_s6 = int_to_ptr.vmem [resolvable:$true] %s478_s6 }
 0x398   :  { %s519_s12 = scalar_lea.vmem %s479_s6, 1024  ;;  %p524_p1 = scmp.lt.s32.totalorder %s479_s6, %s479_s6 }
 0x399   :  { %v374_v36 = vsub.f32 %v366_v34, %v370_v16  ;;  %v375_v37 = vsub.f32 %v367_v35, %v371_v7  ;;  %p520_p0 = scmp.ne.s32.totalorder %s479_s6, %s519_s12  ;;  %p525_p2 = scmp.lt.s32.totalorder %s519_s12, %s519_s12 }
 0x39a   :  { %v431_v58 = vpop.permute.xlu1 %430 }
 0x39b   :  { %v378_v38 = vmax.f32 %v374_v36, 0.0  ;;  %v379_v39 = vmax.f32 %v375_v37, 0.0  ;;  %p526_p3 = por %p525_p2, %p524_p1 }
 0x39d   :  { %v390_v40 = vadd.f32 1e-05, %v378_v38  ;;  %v391_v41 = vadd.f32 1e-05, %v379_v39  ;;  %p527_p4 = pnand %p526_p3, %p520_p0 }
 0x39e   :  { %v436_v61 = vpop.permute.xlu0 %435 }
 0x39f   :  { %v512_v42 = vpop.eup %511  ;;  %515 = vrsqrt.f32 %v390_v40 }
 0x3a0   :  { %517 = vrsqrt.f32 %v391_v41  ;;  %v397_v45 = vmul.f32 %v512_v42, %v321_v44 }
 0x3a1   :  { %v514_v46 = vpop.eup %513 }
 0x3a2   :  { %407 = vperm.xlu1 %502, %v397_v45   ;;  %v396_v47 = vmul.f32 %v514_v46, %v320_v43 }
 0x3a4   :  { %402 = vperm.xlu0 %501, %v396_v47  }
 0x3a9   :  { %v516_v50 = vpop.eup %515 }
 0x3aa   :  { %v518_v53 = vpop.eup %517  ;;  %v398_v54 = vmul.f32 %v516_v50, %v322_v48 }
 0x3ab   :  { %v399_v55 = vmul.f32 %v518_v53, %v323_v49 }
 0x3ac   :  { %412 = vperm.xlu1 %502, %v398_v54  }
 0x3ad   :  { %417 = vperm.xlu0 %501, %v399_v55  }
 0x3b0   :  { %440 = vperm.xlu1 %502, %v326_v56  }
 0x3b1   :  { %445 = vperm.xlu0 %501, %v327_v57  }
 0x421   :  { %v408_v63 = vpop.permute.xlu1 %407 }
 0x422   :  { %v422_v9 = vmul.f32 %v408_v63, %v382_v14  ;;  %v423_v12 = vmul.f32 %v408_v63, %v383_v51 }
 0x423   :  { %v403_v13 = vpop.permute.xlu0 %402 }
 0x424   :  { %v450_v52 = vadd.f32 %v436_v61, %v422_v9  ;;  %v451_v17 = vadd.f32 %v436_v61, %v423_v12  ;;  %v420_v18 = vmul.f32 %v403_v13, %v380_v3  ;;  %v421_v60 = vmul.f32 %v403_v13, %v381_v8 }
 0x426   :  { %v458_v62 = vadd.f32 %v450_v52, %v607_v4  ;;  %v459_v19 = vadd.f32 %v595_v1, %v451_v17  ;;  %v448_v21 = vadd.f32 %v431_v58, %v420_v18  ;;  %v449_v23 = vadd.f32 %v431_v58, %v421_v60 }
 0x428   :  { %465 = vst [vmem:[#allocation2 + $0x8] sm:$0xff] %v458_v62  ;;  %470 = vst [vmem:[#allocation2 + $0x28] sm:$0xff] %v459_v19  ;;  %v456_v14 = vadd.f32 %v448_v21, %v600_v2  ;;  %v457_v51 = vadd.f32 %v590_v0, %v449_v23 }
 0x42a   :  { %464 = vst [vmem:[#allocation2] sm:$0xff] %v456_v14  ;;  %469 = vst [vmem:[#allocation2 + $0x20] sm:$0xff] %v457_v51 }
 0x42b   :  { %v413_v31 = vpop.permute.xlu1 %412 }
 0x42c   :  { %v418_v3 = vpop.permute.xlu0 %417  ;;  %v424_v24 = vmul.f32 %v413_v31, %v384_v30  ;;  %v425_v25 = vmul.f32 %v413_v31, %v385_v33 }
 0x42d   :  { %v426_v32 = vmul.f32 %v418_v3, %v386_v22  ;;  %v427_v59 = vmul.f32 %v418_v3, %v387_v29 }
 0x42f   :  { %v441_v8 = vpop.permute.xlu1 %440 }
 0x430   :  { %v446_v1 = vpop.permute.xlu0 %445  ;;  %v452_v4 = vadd.f32 %v441_v8, %v424_v24  ;;  %v453_v26 = vadd.f32 %v441_v8, %v425_v25 }
 0x431   :  { %v454_v27 = vadd.f32 %v446_v1, %v426_v32  ;;  %v455_v15 = vadd.f32 %v446_v1, %v427_v59 }
 0x432   :  { %v460_v2 = vadd.f32 %v452_v4, %v628_v10  ;;  %v461_v0 = vadd.f32 %v612_v5, %v453_v26 }
 0x433   :  { %v462_v16 = vadd.f32 %v454_v27, %v633_v11  ;;  %v463_v28 = vadd.f32 %v617_v6, %v455_v15 }
 0x434   :  { %466 = vst [vmem:[#allocation2 + $0x10] sm:$0xff] %v460_v2  ;;  %471 = vst [vmem:[#allocation2 + $0x30] sm:$0xff] %v461_v0 }
 0x435   :  { %467 = vst [vmem:[#allocation2 + $0x18] sm:$0xff] %v462_v16  ;;  %472 = vst [vmem:[#allocation2 + $0x38] sm:$0xff] %v463_v28 }
 0x436   :  { %530 = shalt.err (!%p527_p4)
}
 0x437   :  { %s531_s15 = scalar_lea.hbm %s894_s7, 1024 }
 0x438   :  { %p532_p5 = scmp.ne.s32.totalorder %s894_s7, %s531_s15  ;;  %p535_p6 = scmp.lt.u32.totalorder %s531_s15, %s894_s7 }
 0x43a   :  { %p537_p7 = pnand %p535_p6, %p532_p5 }
 0x43c   :  { %540 = shalt.err (!%p537_p7)
}
 0x43d   :  { %s545_s18 = smov 128   ;;  %s546_s19 = smov 8  }
 0x43e   :  { %484 = dma.vmem_to_hbm [thread:$0]  %s479_s6, 1024, %s894_s7, [#allocation3], %s545_s18, %s545_s18, %s546_s19  }
 0x43f   :  { %541 = dma.done.wait [#allocation3], 1024  }
 0x440   :  { %542 = vsyncadd [#allocation3], 4294966272 }
 0x441   :  { %488 = vsyncpa [#allocation3], 1 }

</bundles_post_ra>
